<compile_context>
chip_gen: v7x
topology: tpu7x:2x2x1
jax: 0.10.0
libtpu: 0.0.40
codegen_flags: <defaults>
</compile_context>

<pallas_src>
import functools

import jax
import jax.numpy as jnp
from jax.experimental import pallas as pl
from jax.experimental.pallas import tpu as pltpu


def _swish_kernel(x_ref, o_ref, *, compute_dtype):
    xf = x_ref[...].astype(compute_dtype)
    # sigmoid(x) = 1 / (1 + exp(-x)): exp on the EUP slot, divide on the VPU.
    sig = 1.0 / (1.0 + jnp.exp(-xf))
    o_ref[...] = (xf * sig).astype(o_ref.dtype)


def _cdiv(a, b):
    return -(-a // b)


def _round_up(a, b):
    return _cdiv(a, b) * b


def _chip_kind():
    try:
        return jax.devices()[0].device_kind.lower()
    except Exception:
        return "unknown"


def _swish_plain(x, compute_dtype):
    xf = x.astype(compute_dtype)
    return (xf * jax.nn.sigmoid(xf)).astype(x.dtype)


def swish(x, *, target_block_bytes=None, min_pallas_bytes=64 * 1024,
          donate_input=False):
    """Elementwise x * sigmoid(x). Hot path runs in Pallas; matches torch semantics."""
    orig_shape = x.shape
    dtype = x.dtype
    n = x.size
    if n == 0:
        return x

    itemsize = jnp.dtype(dtype).itemsize
    kind = _chip_kind()
    is_v7 = "7" in kind
    is_v6 = "v6" in kind or "6e" in kind

    # Compute dtype: native bf16 on chips with bf16 VPU/EUP; f32 otherwise.
    if dtype == jnp.bfloat16 and (is_v6 or is_v7):
        compute_dtype = jnp.bfloat16
    else:
        compute_dtype = jnp.float32

    # Tiny activations: let XLA fuse the elementwise op (Pallas dispatch +
    # per-grid-step overhead would dominate).
    if n * itemsize < min_pallas_bytes:
        return _swish_plain(x, compute_dtype).reshape(orig_shape)

    lanes = 128
    # Dtype-aware sublane granule: 8 for 32-bit, 16 for bf16, 32 for int8.
    sublanes = max(8, 32 // max(itemsize, 1))

    # Generation-aware block size and scoped-VMEM limit.
    min_blocks = 4 if is_v7 else 1          # 2 TensorCores on v7x -> >=2 blocks each
    vmem_limit_bytes = None
    if target_block_bytes is None:
        if is_v7:
            target_block_bytes = 8 << 20    # ~8 MiB blocks
            vmem_limit_bytes = 48 << 20     # 4 x 8 MiB double-buffered + slack (< 64 MiB phys)
        elif is_v6:
            target_block_bytes = 4 << 20    # 16 MiB total, inside 32 MiB scoped default
        else:
            target_block_bytes = 2 << 20    # safe on v5e (16 MiB scoped default)

    # Flat split: head (multiple of 128 lanes) runs in Pallas; the <=127-element
    # tail (rare) is handled in plain jnp -- no full-array pad, no [:n] slice.
    x_flat = x.reshape(-1)
    n_main = (n // lanes) * lanes
    if n_main == 0:
        return _swish_plain(x, compute_dtype).reshape(orig_shape)

    rows = n_main // lanes
    x2d = (x_flat if n_main == n else x_flat[:n_main]).reshape(rows, lanes)

    # Balanced blocks; grid = cdiv(rows, tr) so the last (partial) block is
    # masked by Pallas instead of rounding rows up.
    tr_target = max(
        sublanes,
        (target_block_bytes // (lanes * itemsize)) // sublanes * sublanes,
    )
    nblocks = max(min_blocks, _cdiv(rows, tr_target))
    if min_blocks > 1 and nblocks % 2:
        nblocks += 1                                   # even split across the 2 TCs
    nblocks = min(nblocks, _cdiv(rows, sublanes))      # keep >= one granule per block
    tr = _round_up(_cdiv(rows, nblocks), sublanes)
    grid_n = _cdiv(rows, tr)

    cp_kwargs = dict(dimension_semantics=("parallel",))
    if vmem_limit_bytes is not None:
        cp_kwargs["vmem_limit_bytes"] = int(vmem_limit_bytes)

    call_kwargs = {}
    if donate_input:
        # Reuses the input buffer for the output (only when the caller donates x).
        call_kwargs["input_output_aliases"] = {0: 0}

    kernel = functools.partial(_swish_kernel, compute_dtype=compute_dtype)

    out2d = pl.pallas_call(
        kernel,
        out_shape=jax.ShapeDtypeStruct((rows, lanes), dtype),
        grid_spec=pltpu.PrefetchScalarGridSpec(
            num_scalar_prefetch=0,
            grid=(grid_n,),
            in_specs=[pl.BlockSpec((tr, lanes), lambda i: (i, 0))],
            out_specs=pl.BlockSpec((tr, lanes), lambda i: (i, 0)),
        ),
        compiler_params=pltpu.CompilerParams(**cp_kwargs),
        cost_estimate=pl.CostEstimate(
            flops=5 * n_main,
            transcendentals=n_main,
            bytes_accessed=2 * n_main * itemsize,
        ),
        **call_kwargs,
    )(x2d)

    if n_main == n:
        # Fast path: no copies beyond the (free) contiguous reshape.
        return out2d.reshape(orig_shape)

    # Rare unaligned tail (< 128 elements): plain jnp + one small concat.
    tail_out = _swish_plain(x_flat[n_main:], compute_dtype)
    return jnp.concatenate([out2d.reshape(-1), tail_out]).reshape(orig_shape)


if __name__ == "__main__":
    key = jax.random.PRNGKey(0)
    k1, k2, k3 = jax.random.split(key, 3)

    # Small NCHW activation matching the original conv-style usage.
    x1 = jax.random.normal(k1, (2, 4, 16, 16), dtype=jnp.float32)

    # 1) Default path: tiny input -> plain-JAX fallback (XLA fuses it).
    y_fallback = jax.block_until_ready(swish(x1))

    # 2) Forced Pallas path on a 128-aligned flat size (2048 = 16 * 128).
    y_pallas = jax.block_until_ready(swish(x1, min_pallas_bytes=0))

    ref1 = x1 * jax.nn.sigmoid(x1)
    assert y_pallas.shape == x1.shape and y_pallas.dtype == x1.dtype
    assert jnp.allclose(y_fallback, ref1, atol=1e-5, rtol=1e-5), "fallback mismatch"
    assert jnp.allclose(y_pallas, ref1, atol=1e-5, rtol=1e-5), "pallas mismatch"

    # 3) Unaligned flat size (3*5*7*11 = 1155): masked edge block + jnp tail.
    x2 = jax.random.normal(k2, (3, 5, 7, 11), dtype=jnp.float32)
    y2 = jax.block_until_ready(swish(x2, min_pallas_bytes=0))
    ref2 = x2 * jax.nn.sigmoid(x2)
    assert jnp.allclose(y2, ref2, atol=1e-5, rtol=1e-5), "unaligned mismatch"

    # 4) bf16 input (native bf16 compute on v6e/v7x, f32 elsewhere).
    x3 = jax.random.normal(k3, (2, 4, 16, 16), dtype=jnp.bfloat16)
    y3 = jax.block_until_ready(swish(x3, min_pallas_bytes=0))
    ref3 = x3.astype(jnp.float32) * jax.nn.sigmoid(x3.astype(jnp.float32))
    assert y3.dtype == jnp.bfloat16
    assert jnp.allclose(y3.astype(jnp.float32), ref3, atol=2e-2, rtol=2e-2), "bf16 mismatch"

    print("KERNEL_OK")
</pallas_src>

<mosaic_0001>
module attributes {stable_mosaic.version = 11 : i64} {
  func.func @_swish_kernel(%arg0: i32, %arg1: memref<16x128xf32, #tpu.memory_space<vmem>>, %arg2: memref<16x128xf32, #tpu.memory_space<vmem>>) attributes {dimension_semantics = [#tpu.dimension_semantics<parallel>], iteration_bounds = array<i64: 1>, scalar_prefetch = 0 : i64, scratch_operands = 0 : i64, tpu.core_type = #tpu.core_type<tc>, window_params = [{transform_indices = @transform_0, window_bounds = array<i64: 16, 128>}, {transform_indices = @transform_1, window_bounds = array<i64: 16, 128>}]} {
    %c0 = arith.constant 0 : index
    %c0_0 = arith.constant 0 : index
    %0 = vector.load %arg1[%c0, %c0_0] : memref<16x128xf32, #tpu.memory_space<vmem>>, vector<16x128xf32>
    %cst = arith.constant 0.000000e+00 : f32
    %1 = vector.broadcast %cst : f32 to vector<16x128xf32>
    %2 = arith.subf %1, %0 : vector<16x128xf32>
    %3 = math.exp %2 : vector<16x128xf32>
    %cst_1 = arith.constant 1.000000e+00 : f32
    %4 = vector.broadcast %cst_1 : f32 to vector<16x128xf32>
    %5 = arith.addf %4, %3 : vector<16x128xf32>
    %cst_2 = arith.constant 1.000000e+00 : f32
    %6 = vector.broadcast %cst_2 : f32 to vector<16x128xf32>
    %7 = arith.divf %6, %5 : vector<16x128xf32>
    %8 = arith.mulf %0, %7 : vector<16x128xf32>
    %c0_3 = arith.constant 0 : index
    %c0_4 = arith.constant 0 : index
    %9 = vector.load %arg2[%c0_3, %c0_4] : memref<16x128xf32, #tpu.memory_space<vmem>>, vector<16x128xf32>
    tpu.vector_store %arg2[%c0_3, %c0_4], %8 {strides = array<i32>} : memref<16x128xf32, #tpu.memory_space<vmem>>, vector<16x128xf32>,
    return
  }
  func.func @transform_0(%arg0: i32) -> (i32, i32) {
    %c0_i32 = arith.constant 0 : i32
    %c0_i32_0 = arith.constant 0 : i32
    return %arg0, %c0_i32 : i32, i32
  }
  func.func @transform_1(%arg0: i32) -> (i32, i32) {
    %c0_i32 = arith.constant 0 : i32
    %c0_i32_0 = arith.constant 0 : i32
    return %arg0, %c0_i32 : i32, i32
  }
}

</mosaic_0001>

<bundles_post_ra>
// kernel: tpu_custom_call.1
= control target key start
LH: loop header
LB: loop body
LE: loop exit
PB: predicated region body
PF: predicated region fallthrough
CT: control target
= control target key end

     0   :  { %6 = vsyncpa [#allocation3], 0  ;;  %s162_s0 = inlined_call_operand.hbm [shape: f32[16,128], index: 0, kind: input, shape index: {}]   ;;  %s163_s1 = inlined_call_operand.hbm [shape: f32[16,128], index: 1, kind: output, shape index: {}]  }
   0x1   :  { %7 = vsyncpa [#allocation4], 0  ;;  %s118_s6 = smov [#allocation2]   ;;  %s70_s10 = scalar_lea.hbm %s162_s0, 256 }
   0x2   :  { %s13_s7 = sshll.u32 %s118_s6, 4  ;;  %p71_p0 = scmp.ne.s32.totalorder %s162_s0, %s70_s10  ;;  %s14_s7 = int_to_ptr.vmem [resolvable:$true] %s13_s7 }
   0x3   :  { %p74_p1 = scmp.lt.u32.totalorder %s70_s10, %s162_s0 }
   0x5   :  { %p76_p2 = pnand %p74_p1, %p71_p0 }
   0x7   :  { %79 = shalt.err (!%p76_p2)
}
   0x8   :  { %s80_s15 = scalar_lea.vmem %s14_s7, 256  ;;  %p85_p4 = scmp.lt.s32.totalorder %s14_s7, %s14_s7 }
   0x9   :  { %p81_p3 = scmp.ne.s32.totalorder %s14_s7, %s80_s15  ;;  %p86_p5 = scmp.lt.s32.totalorder %s80_s15, %s80_s15 }
   0xb   :  { %p87_p6 = por %p86_p5, %p85_p4 }
   0xd   :  { %p88_p7 = pnand %p87_p6, %p81_p3 }
   0xf   :  { %91 = shalt.err (!%p88_p7)
}
  0x10   :  { %s119_s16 = smov 128   ;;  %s120_s17 = smov 8  }
  0x11   :  { %19 = dma.hbm_to_vmem [thread:$0]  %s162_s0, 256, %s14_s7, [#allocation3], %s119_s16, %s119_s16, %s120_s17  }
  0x12   :  { %114 = dma.done.wait [#allocation3], 256  }
  0x13   :  { %115 = vsyncadd [#allocation3], 4294967040  ;;  %v23_v0 = vld [vmem:[#allocation2] sm:$0xff]  ;;  %v24_v1 = vld [vmem:[#allocation2 + $0x8] sm:$0xff]  ;;  %s121_s20 = smov [#allocation5]  }
  0x14   :  { %v25_v2 = vsub.f32 0.0, %v23_v0  ;;  %v26_v3 = vsub.f32 0.0, %v24_v1  ;;  %s46_s21 = sshll.u32 %s121_s20, 4  ;;  %s47_s21 = int_to_ptr.vmem [resolvable:$true] %s46_s21 }
  0x15   :  { %s92_s0 = scalar_lea.vmem %s47_s21, 256  ;;  %p97_p9 = scmp.lt.s32.totalorder %s47_s21, %s47_s21 }
  0x16   :  { %v27_v4 = vmul.f32 1.442695, %v25_v2  ;;  %v29_v5 = vmul.f32 1.442695, %v26_v3  ;;  %p93_p8 = scmp.ne.s32.totalorder %s47_s21, %s92_s0  ;;  %p98_p10 = scmp.lt.s32.totalorder %s92_s0, %s92_s0 }
  0x18   :  { %62 = vpow2.f32 %v27_v4  ;;  %p99_p11 = por %p98_p10, %p97_p9 }
  0x19   :  { %64 = vpow2.f32 %v29_v5 }
  0x1a   :  { %p100_p12 = pnand %p99_p11, %p93_p8 }
  0x22   :  { %v63_v6 = vpop.eup %62 }
  0x23   :  { %v65_v7 = vpop.eup %64  ;;  %v31_v8 = vadd.f32 1.0, %v63_v6 }
  0x24   :  { %v32_v9 = vadd.f32 1.0, %v65_v7 }
  0x25   :  { %66 = vrcp.f32 %v31_v8 }
  0x26   :  { %68 = vrcp.f32 %v32_v9 }
  0x2f   :  { %v67_v10 = vpop.eup %66 }
  0x30   :  { %v69_v11 = vpop.eup %68  ;;  %v37_v12 = vmul.f32 %v67_v10, %v23_v0 }
  0x31   :  { %v38_v13 = vmul.f32 %v69_v11, %v24_v1 }
  0x32   :  { %39 = vst [vmem:[#allocation5] sm:$0xff] %v37_v12 }
  0x33   :  { %40 = vst [vmem:[#allocation5 + $0x8] sm:$0xff] %v38_v13 }
  0x34   :  { %103 = shalt.err (!%p100_p12)
}
  0x35   :  { %s104_s24 = scalar_lea.hbm %s163_s1, 256 }
  0x36   :  { %p105_p13 = scmp.ne.s32.totalorder %s163_s1, %s104_s24  ;;  %p108_p0 = scmp.lt.u32.totalorder %s104_s24, %s163_s1 }
  0x38   :  { %p110_p1 = pnand %p108_p0, %p105_p13 }
  0x3a   :  { %113 = shalt.err (!%p110_p1)
}
  0x3b   :  { %52 = dma.vmem_to_hbm [thread:$0]  %s47_s21, 256, %s163_s1, [#allocation4], %s119_s16, %s119_s16, %s120_s17  }
  0x3c   :  { %116 = dma.done.wait [#allocation4], 256  }
  0x3d   :  { %117 = vsyncadd [#allocation4], 4294967040 }
  0x3e   :  { %56 = vsyncpa [#allocation3], 1 }
  0x3f   :  { %57 = vsyncpa [#allocation4], 1 }

</bundles_post_ra>
